<compile_context>
chip_gen: v7x
topology: tpu7x:2x2x1
jax: 0.10.0
libtpu: 0.0.40
codegen_flags: <defaults>
</compile_context>

<pallas_src>
import functools

import jax
import jax.numpy as jnp
from jax.experimental import pallas as pl
from jax.experimental.pallas import tpu as pltpu


_LANE = 128
_MAX_X_TILE_BYTES = 2 * 1024 * 1024   # per x tile; see header for VMEM budget


# ------------------------------- helpers -------------------------------------


def _cdiv(a, b):
    return -(-a // b)


def _round_down(a, m):
    return (a // m) * m


def _sublane_pack(dtype):
    """Rows per packed sublane group: 8 for f32, 16 for bf16, 32 for int8/fp8."""
    return max(8, 32 // jnp.dtype(dtype).itemsize)


def _choose_tiles(rc, hw, dtype):
    """(row_tile, lane_tile) for an (rc, hw) array: lane-dense, dtype-aware,
    VMEM-budgeted, and preferring >= 2 row blocks for megacore sharding."""
    itemsize = jnp.dtype(dtype).itemsize
    pack = _sublane_pack(dtype)

    # Lane tile: multiple of 128 up to 2048; prefer an exact divisor of hw.
    if hw <= _LANE:
        tl = hw                                     # full-dim block
    else:
        tl = min(_round_down(hw, _LANE), 2048)
        for cand in (2048, 1024, 512, 256, 128):
            if cand <= tl and hw % cand == 0:
                tl = cand
                break

    # Row tile: multiple of the sublane pack, capped by the VMEM tile budget.
    if rc <= pack:
        tr = rc                                     # full-dim block
    else:
        budget_rows = max(pack,
                          _round_down(_MAX_X_TILE_BYTES // (tl * itemsize), pack))
        tr = max(pack, min(_round_down(rc, pack), budget_rows, 512))
        # Keep >= 2 row blocks when possible (v7x has 2 TensorCores per chip).
        if _cdiv(rc, tr) < 2 and rc >= 2 * pack:
            tr = max(pack, _round_down(_cdiv(rc, 2), pack))
    return tr, tl


# ----------------------------- Pallas kernels --------------------------------


def _rowstats_kernel(x_ref, sum_ref, sumsq_ref, *, hw, tl):
    """Per-row sum / sum-of-squares, accumulated across the lane grid axis.

    x_ref: (TR, TL); sum_ref/sumsq_ref: (TR, 1) f32 output accumulators.
    """
    l = pl.program_id(1)

    @pl.when(l == 0)
    def _():
        sum_ref[...] = jnp.zeros_like(sum_ref)
        sumsq_ref[...] = jnp.zeros_like(sumsq_ref)

    x = x_ref[...].astype(jnp.float32)
    if hw % tl != 0:
        # Mask the lane tail of the last (padded) block so garbage reads
        # never enter the reduction.
        lane = jax.lax.broadcasted_iota(jnp.int32, x.shape, 1) + l * tl
        x = jnp.where(lane < hw, x, 0.0)

    sum_ref[...] += jnp.sum(x, axis=1, keepdims=True)
    sumsq_ref[...] += jnp.sum(x * x, axis=1, keepdims=True)


def _affine_kernel(x_ref, scale_ref, shift_ref, o_ref):
    """Hot path: y = x * scale + shift (scale already exp'ed), per-row params.

    x_ref / o_ref: (TR, TL); scale_ref / shift_ref: (TR, 1) f32.
    """
    x = x_ref[...].astype(jnp.float32)
    o_ref[...] = (x * scale_ref[...] + shift_ref[...]).astype(o_ref.dtype)


# ------------------------------ Host wrappers ---------------------------------


def _rowstats_pallas(x2):
    """x2: (N*C, HW) -> per-row (sum, sum_sq), each (N*C, 1) f32."""
    rc, hw = x2.shape
    tr, tl = _choose_tiles(rc, hw, x2.dtype)
    grid = (_cdiv(rc, tr), _cdiv(hw, tl))
    kernel = functools.partial(_rowstats_kernel, hw=hw, tl=tl)
    return pl.pallas_call(
        kernel,
        out_shape=(
            jax.ShapeDtypeStruct((rc, 1), jnp.float32),
            jax.ShapeDtypeStruct((rc, 1), jnp.float32),
        ),
        grid_spec=pltpu.PrefetchScalarGridSpec(
            num_scalar_prefetch=0,
            grid=grid,
            in_specs=[pl.BlockSpec((tr, tl), lambda r, l: (r, l))],
            out_specs=(
                pl.BlockSpec((tr, 1), lambda r, l: (r, 0)),
                pl.BlockSpec((tr, 1), lambda r, l: (r, 0)),
            ),
        ),
        compiler_params=pltpu.CompilerParams(
            dimension_semantics=("parallel", "arbitrary")),  # lanes = reduction
    )(x2)


def _affine_pallas(x2, scale_rows, shift_rows):
    """x2: (N*C, HW); scale_rows/shift_rows: (N*C, 1) f32 -> y: (N*C, HW)."""
    rc, hw = x2.shape
    tr, tl = _choose_tiles(rc, hw, x2.dtype)
    grid = (_cdiv(rc, tr), _cdiv(hw, tl))
    return pl.pallas_call(
        _affine_kernel,
        out_shape=jax.ShapeDtypeStruct((rc, hw), x2.dtype),
        grid_spec=pltpu.PrefetchScalarGridSpec(
            num_scalar_prefetch=0,
            grid=grid,
            in_specs=[
                pl.BlockSpec((tr, tl), lambda r, l: (r, l)),
                pl.BlockSpec((tr, 1), lambda r, l: (r, 0)),
                pl.BlockSpec((tr, 1), lambda r, l: (r, 0)),
            ],
            out_specs=pl.BlockSpec((tr, tl), lambda r, l: (r, l)),
        ),
        compiler_params=pltpu.CompilerParams(
            dimension_semantics=("parallel", "parallel")),   # megacore on v7x
    )(x2, scale_rows, shift_rows)


def actnorm_forward(x, log_scale, shift, initialized, *, eps=1e-5):
    """ActNorm forward (functional: returns new params / initialized flag).

    x:           (N, C, H, W)  (NCHW, channel dim = 1), f32 or bf16
    log_scale:   (C,) f32 parameter
    shift:       (C,) f32 parameter
    initialized: bool scalar (the `_initialized` buffer)

    Returns (y, new_log_scale, new_shift, new_initialized).
    """
    n, c, h, w = x.shape
    hw = h * w

    # Free, contiguous view — no transposes, full sublane occupancy even for
    # small C (row index = n_idx*C + c_idx, so channel = row % C).
    x2 = x.reshape(n * c, hw)

    def _use_existing():
        return log_scale.astype(jnp.float32), shift.astype(jnp.float32)

    def _compute_stats():
        # TODO(synk): optionally fuse the affine into this pass so the init
        # call reads x from HBM once instead of twice (one-time cost).
        sum_rows, sumsq_rows = _rowstats_pallas(x2)
        s1 = sum_rows.reshape(n, c).sum(axis=0)      # fold batch copies -> (C,)
        s2 = sumsq_rows.reshape(n, c).sum(axis=0)    # (C,)
        m = n * hw
        mean = s1 / m
        # NOTE: E[x^2]-E[x]^2 accumulated in f32; clamp guards fp round-off.
        # Switch to a shifted/Welford merge if init must match torch.var_mean
        # exactly at very large counts / large-mean activations.
        var = jnp.maximum((s2 - m * mean * mean) / max(m - 1, 1), 0.0)
        inv_std = jax.lax.rsqrt(var + eps)
        return jnp.log(inv_std), -mean * inv_std

    new_log_scale, new_shift = jax.lax.cond(
        initialized, _use_existing, _compute_stats)

    # Hoist exp() out of the kernel; expand params to per-row (tiny, N*C elems).
    scale_rows = jnp.tile(jnp.exp(new_log_scale), n).reshape(n * c, 1)
    shift_rows = jnp.tile(new_shift, n).reshape(n * c, 1)

    y = _affine_pallas(x2, scale_rows, shift_rows).reshape(n, c, h, w)

    return y, new_log_scale, new_shift, jnp.array(True)


# ---------------------------------- Main --------------------------------------

if __name__ == "__main__":
    key = jax.random.PRNGKey(0)
    N, C, H, W = 2, 4, 16, 16
    x = jax.random.normal(key, (N, C, H, W), dtype=jnp.float32) * 2.0 + 0.5

    # Deterministic parameter init (matches nn.Parameter(torch.zeros(C))).
    log_scale = jnp.zeros((C,), dtype=jnp.float32)
    shift = jnp.zeros((C,), dtype=jnp.float32)
    initialized = jnp.array(False)

    fwd = jax.jit(actnorm_forward)

    # First call: data-dependent init + affine.
    y1, log_scale, shift, initialized = fwd(x, log_scale, shift, initialized)
    jax.block_until_ready(y1)

    # Second call: initialized=True path (stats kernel is skipped at runtime).
    y2, _, _, _ = fwd(x, log_scale, shift, initialized)
    jax.block_until_ready(y2)

    # Pure-JAX reference check.
    mean = jnp.mean(x, axis=(0, 2, 3))
    var = jnp.var(x, axis=(0, 2, 3), ddof=1)
    inv_std = jax.lax.rsqrt(var + 1e-5)
    ref = x * inv_std.reshape(1, C, 1, 1) + (-mean * inv_std).reshape(1, C, 1, 1)

    assert jnp.allclose(y1, ref, atol=1e-4, rtol=1e-4)
    assert jnp.allclose(y2, ref, atol=1e-4, rtol=1e-4)
    assert jnp.allclose(log_scale, jnp.log(inv_std), atol=1e-4)

    print("KERNEL_OK")
</pallas_src>

<mosaic_0001>
module attributes {stable_mosaic.version = 11 : i64} {
  func.func @_rowstats_kernel(%arg0: i32, %arg1: i32, %arg2: memref<8x256xf32, #tpu.memory_space<vmem>>, %arg3: memref<8x1xf32, #tpu.memory_space<vmem>>, %arg4: memref<8x1xf32, #tpu.memory_space<vmem>>) attributes {dimension_semantics = [#tpu.dimension_semantics<parallel>, #tpu.dimension_semantics<arbitrary>], iteration_bounds = array<i64: 1, 1>, scalar_prefetch = 0 : i64, scratch_operands = 0 : i64, tpu.core_type = #tpu.core_type<tc>, window_params = [{transform_indices = @transform_0, window_bounds = array<i64: 8, 256>}, {transform_indices = @transform_1, window_bounds = array<i64: 8, 1>}, {transform_indices = @transform_2, window_bounds = array<i64: 8, 1>}]} {
    %c0_i32 = arith.constant 0 : i32
    %0 = arith.cmpi eq, %arg1, %c0_i32 : i32
    %1 = arith.extui %0 : i1 to i32
    %c0_i32_0 = arith.constant 0 : i32
    %2 = arith.cmpi ne, %1, %c0_i32_0 : i32
    scf.if %2 {
      %cst_11 = arith.constant 0.000000e+00 : f32
      %15 = vector.broadcast %cst_11 : f32 to vector<8x1xf32>
      %c0_12 = arith.constant 0 : index
      %c0_13 = arith.constant 0 : index
      %16 = vector.load %arg3[%c0_12, %c0_13] : memref<8x1xf32, #tpu.memory_space<vmem>>, vector<8x1xf32>
      tpu.vector_store %arg3[%c0_12, %c0_13], %15 {strides = array<i32>} : memref<8x1xf32, #tpu.memory_space<vmem>>, vector<8x1xf32>,
      %cst_14 = arith.constant 0.000000e+00 : f32
      %17 = vector.broadcast %cst_14 : f32 to vector<8x1xf32>
      %c0_15 = arith.constant 0 : index
      %c0_16 = arith.constant 0 : index
      %18 = vector.load %arg4[%c0_15, %c0_16] : memref<8x1xf32, #tpu.memory_space<vmem>>, vector<8x1xf32>
      tpu.vector_store %arg4[%c0_15, %c0_16], %17 {strides = array<i32>} : memref<8x1xf32, #tpu.memory_space<vmem>>, vector<8x1xf32>,
    } else {
    }
    %c0 = arith.constant 0 : index
    %c0_1 = arith.constant 0 : index
    %3 = vector.load %arg2[%c0, %c0_1] : memref<8x256xf32, #tpu.memory_space<vmem>>, vector<8x256xf32>
    %c0_2 = arith.constant 0 : index
    %c0_3 = arith.constant 0 : index
    %4 = vector.load %arg3[%c0_2, %c0_3] : memref<8x1xf32, #tpu.memory_space<vmem>>, vector<8x1xf32>
    %cst = arith.constant dense<0.000000e+00> : vector<8xf32>
    %5 = vector.multi_reduction <add>, %3, %cst [1] : vector<8x256xf32> to vector<8xf32>
    %6 = vector.shape_cast %5 : vector<8xf32> to vector<8x1xf32>
    %7 = arith.addf %4, %6 : vector<8x1xf32>
    %c0_4 = arith.constant 0 : index
    %c0_5 = arith.constant 0 : index
    %8 = vector.load %arg3[%c0_4, %c0_5] : memref<8x1xf32, #tpu.memory_space<vmem>>, vector<8x1xf32>
    tpu.vector_store %arg3[%c0_4, %c0_5], %7 {strides = array<i32>} : memref<8x1xf32, #tpu.memory_space<vmem>>, vector<8x1xf32>,
    %c0_6 = arith.constant 0 : index
    %c0_7 = arith.constant 0 : index
    %9 = vector.load %arg4[%c0_6, %c0_7] : memref<8x1xf32, #tpu.memory_space<vmem>>, vector<8x1xf32>
    %10 = arith.mulf %3, %3 : vector<8x256xf32>
    %cst_8 = arith.constant dense<0.000000e+00> : vector<8xf32>
    %11 = vector.multi_reduction <add>, %10, %cst_8 [1] : vector<8x256xf32> to vector<8xf32>
    %12 = vector.shape_cast %11 : vector<8xf32> to vector<8x1xf32>
    %13 = arith.addf %9, %12 : vector<8x1xf32>
    %c0_9 = arith.constant 0 : index
    %c0_10 = arith.constant 0 : index
    %14 = vector.load %arg4[%c0_9, %c0_10] : memref<8x1xf32, #tpu.memory_space<vmem>>, vector<8x1xf32>
    tpu.vector_store %arg4[%c0_9, %c0_10], %13 {strides = array<i32>} : memref<8x1xf32, #tpu.memory_space<vmem>>, vector<8x1xf32>,
    return
  }
  func.func @transform_0(%arg0: i32, %arg1: i32) -> (i32, i32) {
    %c0_i32 = arith.constant 0 : i32
    return %arg0, %arg1 : i32, i32
  }
  func.func @transform_1(%arg0: i32, %arg1: i32) -> (i32, i32) {
    %c0_i32 = arith.constant 0 : i32
    %c0_i32_0 = arith.constant 0 : i32
    return %arg0, %c0_i32 : i32, i32
  }
  func.func @transform_2(%arg0: i32, %arg1: i32) -> (i32, i32) {
    %c0_i32 = arith.constant 0 : i32
    %c0_i32_0 = arith.constant 0 : i32
    return %arg0, %c0_i32 : i32, i32
  }
}

module attributes {stable_mosaic.version = 11 : i64} {
  func.func @_affine_kernel(%arg0: i32, %arg1: i32, %arg2: memref<8x256xf32, #tpu.memory_space<vmem>>, %arg3: memref<8x1xf32, #tpu.memory_space<vmem>>, %arg4: memref<8x1xf32, #tpu.memory_space<vmem>>, %arg5: memref<8x256xf32, #tpu.memory_space<vmem>>) attributes {dimension_semantics = [#tpu.dimension_semantics<parallel>, #tpu.dimension_semantics<parallel>], iteration_bounds = array<i64: 1, 1>, scalar_prefetch = 0 : i64, scratch_operands = 0 : i64, tpu.core_type = #tpu.core_type<tc>, window_params = [{transform_indices = @transform_0, window_bounds = array<i64: 8, 256>}, {transform_indices = @transform_1, window_bounds = array<i64: 8, 1>}, {transform_indices = @transform_2, window_bounds = array<i64: 8, 1>}, {transform_indices = @transform_3, window_bounds = array<i64: 8, 256>}]} {
    %c0 = arith.constant 0 : index
    %c0_0 = arith.constant 0 : index
    %0 = vector.load %arg2[%c0, %c0_0] : memref<8x256xf32, #tpu.memory_space<vmem>>, vector<8x256xf32>
    %c0_1 = arith.constant 0 : index
    %c0_2 = arith.constant 0 : index
    %1 = vector.load %arg3[%c0_1, %c0_2] : memref<8x1xf32, #tpu.memory_space<vmem>>, vector<8x1xf32>
    %2 = vector.broadcast %1 : vector<8x1xf32> to vector<8x256xf32>
    %3 = arith.mulf %0, %2 : vector<8x256xf32>
    %c0_3 = arith.constant 0 : index
    %c0_4 = arith.constant 0 : index
    %4 = vector.load %arg4[%c0_3, %c0_4] : memref<8x1xf32, #tpu.memory_space<vmem>>, vector<8x1xf32>
    %5 = vector.broadcast %4 : vector<8x1xf32> to vector<8x256xf32>
    %6 = arith.addf %3, %5 : vector<8x256xf32>
    %c0_5 = arith.constant 0 : index
    %c0_6 = arith.constant 0 : index
    %7 = vector.load %arg5[%c0_5, %c0_6] : memref<8x256xf32, #tpu.memory_space<vmem>>, vector<8x256xf32>
    tpu.vector_store %arg5[%c0_5, %c0_6], %6 {strides = array<i32>} : memref<8x256xf32, #tpu.memory_space<vmem>>, vector<8x256xf32>,
    return
  }
  func.func @transform_0(%arg0: i32, %arg1: i32) -> (i32, i32) {
    %c0_i32 = arith.constant 0 : i32
    return %arg0, %arg1 : i32, i32
  }
  func.func @transform_1(%arg0: i32, %arg1: i32) -> (i32, i32) {
    %c0_i32 = arith.constant 0 : i32
    %c0_i32_0 = arith.constant 0 : i32
    return %arg0, %c0_i32 : i32, i32
  }
  func.func @transform_2(%arg0: i32, %arg1: i32) -> (i32, i32) {
    %c0_i32 = arith.constant 0 : i32
    %c0_i32_0 = arith.constant 0 : i32
    return %arg0, %c0_i32 : i32, i32
  }
  func.func @transform_3(%arg0: i32, %arg1: i32) -> (i32, i32) {
    %c0_i32 = arith.constant 0 : i32
    return %arg0, %arg1 : i32, i32
  }
}

</mosaic_0001>

<bundles_post_ra>
// kernel: tile.4
= control target key start
LH: loop header
LB: loop body
LE: loop exit
PB: predicated region body
PF: predicated region fallthrough
CT: control target
= control target key end

     0   :  { %s22_s0 = inlined_call_operand.vmem [shape: f32[4], index: 0, kind: input, shape index: {}]   ;;  %s23_s1 = inlined_call_operand.vmem [shape: f32[2,4], index: 1, kind: output, shape index: {}]  }
   0x1   :  { %v4_v0 = vld [vmem:[%s22_s0] ss:$0 sm:$0xff] }
   0x2   :  { %5 = vst [vmem:[%s23_s1] sm:$0x3] %v4_v0 }

// kernel: tile.9
= control target key start
LH: loop header
LB: loop body
LE: loop exit
PB: predicated region body
PF: predicated region fallthrough
CT: control target
= control target key end

     0   :  { %s95_s0 = inlined_call_operand.vmem [shape: f32[2,4], index: 0, kind: input, shape index: {}]   ;;  %s96_s1 = inlined_call_operand.hbm [shape: f32[8,1], index: 1, kind: output, shape index: {}]  }
   0x1   :  { %v5_v0 = vld [vmem:[%s95_s0] sm:$0x3] }
   0x2   :  { %6 = vst [vmem:[#allocation2] sm:$0x3] %v5_v0 }
   0x3   :  { %2 = vsyncpa [#allocation1], 0  ;;  %s66_s0 = smov 127   ;;  %s67_s8 = smov 125   ;;  %vm8_vm0 = vcmask 7168  }
   0x4   :  { %s68_s9 = smov 126   ;;  %s69_s10 = smov [#allocation0]  }
   0x5   :  { %s32_s11 = sshll.u32 %s69_s10, 4  ;;  %s33_s11 = int_to_ptr.vmem [resolvable:$true] %s32_s11 }
   0x6   :  { %s42_s12 = scalar_lea.vmem %s33_s11, 128  ;;  %p47_p1 = scmp.lt.s32.totalorder %s33_s11, %s33_s11 }
   0x7   :  { %p43_p0 = scmp.ne.s32.totalorder %s33_s11, %s42_s12  ;;  %p48_p2 = scmp.lt.s32.totalorder %s42_s12, %s42_s12 }
   0x9   :  { %v10_v1 = vld [vmem:[#allocation2] sm:$0x3]   ;;  %p49_p3 = por %p48_p2, %p47_p1 }
   0xa   :  { %v22_v2 = vld [vmem:[#allocation2] sm:$0x3]   ;;  %11 = vrot.lane.b32.xlu0 %v10_v1, %s66_s0 }
   0xb   :  { %23 = vrot.lane.b32.xlu1 %v22_v2, %s67_s8  ;;  %v7_v3 = vld [vmem:[#allocation2] sm:$0x3]   ;;  %p50_p4 = pnand %p49_p3, %p43_p0 }
   0xc   :  { %v16_v4 = vld [vmem:[#allocation2] sm:$0x3]   ;;  %9 = vst.msk [vmem:[#allocation0] ss:$4 sm:$0x3] %vm8_vm0, %v7_v3  }
   0xe   :  { %17 = vrot.lane.b32.xlu0 %v16_v4, %s68_s9 }
  0x7c   :  { %v12_v5 = vpop.permute.xlu0 %11  }
  0x7d   :  { %v24_v6 = vpop.permute.xlu1 %23   ;;  %15 = vst.msk [vmem:[#allocation0 + $0x1] ss:$4 sm:$0x3] %vm8_vm0, %v12_v5  }
  0x7e   :  { %27 = vst.msk [vmem:[#allocation0 + $0x3] ss:$4 sm:$0x3] %vm8_vm0, %v24_v6  }
  0x80   :  { %v18_v7 = vpop.permute.xlu0 %17  }
  0x81   :  { %21 = vst.msk [vmem:[#allocation0 + $0x2] ss:$4 sm:$0x3] %vm8_vm0, %v18_v7  }
  0x82   :  { %53 = shalt.err (!%p50_p4)
}
  0x83   :  { %s54_s15 = scalar_lea.hbm %s96_s1, 128 }
  0x84   :  { %p55_p5 = scmp.ne.s32.totalorder %s96_s1, %s54_s15  ;;  %p58_p6 = scmp.lt.u32.totalorder %s54_s15, %s96_s1 }
  0x86   :  { %p60_p7 = pnand %p58_p6, %p55_p5 }
  0x88   :  { %63 = shalt.err (!%p60_p7)
}
  0x89   :  { %35 = dma.vmem_to_hbm [thread:$0]  %s33_s11, 128, %s96_s1, [#allocation1]  }
  0x8a   :  { %64 = dma.done.wait [#allocation1], 128  }
  0x8b   :  { %65 = vsyncadd [#allocation1], 4294967168 }
  0x8c   :  { %37 = vsyncpa [#allocation1], 1 }

// kernel: branch_0_fun.1
= control target key start
LH: loop header
LB: loop body
LE: loop exit
PB: predicated region body
PF: predicated region fallthrough
CT: control target
= control target key end

     0   :  { %8 = vsyncpa [#allocation3], 0  ;;  %s81_s9 = smov [#allocation2]   ;;  %s132_s0 = inlined_call_operand.hbm [shape: f32[8,256], index: 0, kind: input, shape index: {}]   ;;  %s133_s1 = inlined_call_operand.vmem [shape: f32[8,1], index: 1, kind: output, shape index: {0}]   ;;  %s134_s2 = inlined_call_operand.vmem [shape: f32[8,1], index: 2, kind: output, shape index: {1}]  }
   0x1   :  { %s15_s10 = sshll.u32 %s81_s9, 4  ;;  %s57_s13 = scalar_lea.hbm %s132_s0, 256  ;;  %s16_s10 = int_to_ptr.vmem [resolvable:$true] %s15_s10 }
   0x2   :  { %p58_p0 = scmp.ne.s32.totalorder %s132_s0, %s57_s13  ;;  %p61_p1 = scmp.lt.u32.totalorder %s57_s13, %s132_s0 }
   0x4   :  { %p63_p2 = pnand %p61_p1, %p58_p0 }
   0x6   :  { %66 = shalt.err (!%p63_p2)
}
   0x7   :  { %s67_s18 = scalar_lea.vmem %s16_s10, 256  ;;  %p72_p4 = scmp.lt.s32.totalorder %s16_s10, %s16_s10 }
   0x8   :  { %p68_p3 = scmp.ne.s32.totalorder %s16_s10, %s67_s18  ;;  %p73_p5 = scmp.lt.s32.totalorder %s67_s18, %s67_s18 }
   0xa   :  { %p74_p6 = por %p73_p5, %p72_p4 }
   0xc   :  { %p75_p7 = pnand %p74_p6, %p68_p3 }
   0xe   :  { %78 = shalt.err (!%p75_p7)
}
   0xf   :  { %18 = dma.hbm_to_vmem [thread:$0]  %s132_s0, 256, %s16_s10, [#allocation3]  }
  0x10   :  { %79 = dma.done.wait [#allocation3], 256  }
  0x11   :  { %80 = vsyncadd [#allocation3], 4294967040  ;;  %vm26_vm0 = vcmask 7168   ;;  %v82_v0 = vmov 0.0   ;;  %v29_v1 = vld [vmem:[#allocation2] sm:$0xff]  ;;  %v30_v2 = vld [vmem:[#allocation2 + $0x8] sm:$0xff] }
  0x12   :  { %27 = vst.msk [vmem:[%s133_s1] sm:$0xff] %vm26_vm0, %v82_v0  ;;  %28 = vst.msk [vmem:[%s134_s2] sm:$0xff] %vm26_vm0, %v82_v0  ;;  %v32_v3 = vadd.f32 %v30_v2, %v29_v1  ;;  %v39_v4 = vmul.f32 %v29_v1, %v29_v1  ;;  %v40_v5 = vmul.f32 %v30_v2, %v30_v2 }
  0x14   :  { %33 = vadd.xlane.f32.xlu0 %v32_v3  ;;  %v41_v6 = vadd.f32 %v40_v5, %v39_v4 }
  0x18   :  { %42 = vadd.xlane.f32.xlu0 %v41_v6 }
  0x19   :  { %v31_v7 = vld [vmem:[%s133_s1] sm:$0xff] }
  0x1a   :  { %v38_v10 = vld [vmem:[%s134_s2] sm:$0xff] }
  0xa1   :  { %v34_v8 = vpop.xlane.xlu0 %33 }
  0xa2   :  { %v35_v9 = vadd.f32 %v34_v8, %v31_v7 }
  0xa4   :  { %37 = vst.msk [vmem:[%s133_s1] sm:$0xff] %vm26_vm0, %v35_v9 }
  0xa5   :  { %v43_v11 = vpop.xlane.xlu0 %42 }
  0xa6   :  { %v44_v12 = vadd.f32 %v43_v11, %v38_v10 }
  0xa8   :  { %45 = vst.msk [vmem:[%s134_s2] sm:$0xff] %vm26_vm0, %v44_v12 }
  0xa9   :  { %54 = vsyncpa [#allocation3], 1 }

// kernel: actnorm_forward.1
= control target key start
LH: loop header
LB: loop body
LE: loop exit
PB: predicated region body
PF: predicated region fallthrough
CT: control target
= control target key end

     0   :  { %8 = vsyncpa [#allocation3], 0  ;;  %s216_s0 = inlined_call_operand.hbm [shape: f32[8,256], index: 0, kind: input, shape index: {}]   ;;  %s217_s1 = inlined_call_operand.hbm [shape: f32[8,1], index: 1, kind: input, shape index: {}]   ;;  %s218_s2 = inlined_call_operand.hbm [shape: f32[8,1], index: 2, kind: input, shape index: {}]   ;;  %s219_s3 = inlined_call_operand.vmem [shape: f32[8,256], index: 3, kind: output, shape index: {}]  }
   0x1   :  { %9 = vsyncpa [#allocation5], 0  ;;  %s150_s12 = smov [#allocation4]   ;;  %s151_s14 = smov [#allocation2]  }
   0x2   :  { %s26_s13 = sshll.u32 %s150_s12, 4  ;;  %s16_s15 = sshll.u32 %s151_s14, 4  ;;  %s27_s13 = int_to_ptr.vmem [resolvable:$true] %s26_s13  ;;  %s17_s15 = int_to_ptr.vmem [resolvable:$true] %s16_s15 }
   0x3   :  { %s80_s18 = scalar_lea.hbm %s217_s1, 128 }
   0x4   :  { %p81_p0 = scmp.ne.s32.totalorder %s217_s1, %s80_s18  ;;  %p84_p1 = scmp.lt.u32.totalorder %s80_s18, %s217_s1 }
   0x6   :  { %p86_p2 = pnand %p84_p1, %p81_p0 }
   0x8   :  { %89 = shalt.err (!%p86_p2)
}
   0x9   :  { %s90_s23 = scalar_lea.vmem %s27_s13, 128  ;;  %p95_p4 = scmp.lt.s32.totalorder %s27_s13, %s27_s13 }
   0xa   :  { %p91_p3 = scmp.ne.s32.totalorder %s27_s13, %s90_s23  ;;  %p96_p5 = scmp.lt.s32.totalorder %s90_s23, %s90_s23 }
   0xc   :  { %p97_p6 = por %p96_p5, %p95_p4 }
   0xe   :  { %p98_p7 = pnand %p97_p6, %p91_p3 }
  0x10   :  { %101 = shalt.err (!%p98_p7)
}
  0x11   :  { %29 = dma.hbm_to_vmem [thread:$0]  %s217_s1, 128, %s27_s13, [#allocation5]  }
  0x12   :  { %s102_s28 = scalar_lea.hbm %s216_s0, 256 }
  0x13   :  { %p103_p8 = scmp.ne.s32.totalorder %s216_s0, %s102_s28  ;;  %p106_p9 = scmp.lt.u32.totalorder %s102_s28, %s216_s0 }
  0x15   :  { %p108_p10 = pnand %p106_p9, %p103_p8 }
  0x17   :  { %111 = shalt.err (!%p108_p10)
}
  0x18   :  { %s112_s6 = scalar_lea.vmem %s17_s15, 256  ;;  %p117_p12 = scmp.lt.s32.totalorder %s17_s15, %s17_s15 }
  0x19   :  { %p113_p11 = scmp.ne.s32.totalorder %s17_s15, %s112_s6  ;;  %p118_p13 = scmp.lt.s32.totalorder %s112_s6, %s112_s6 }
  0x1b   :  { %p119_p0 = por %p118_p13, %p117_p12 }
  0x1d   :  { %p120_p1 = pnand %p119_p0, %p113_p11 }
  0x1f   :  { %123 = shalt.err (!%p120_p1)
}
  0x20   :  { %19 = dma.hbm_to_vmem [thread:$0]  %s216_s0, 256, %s17_s15, [#allocation3]  }
  0x21   :  { %s152_s8 = smov [#allocation6]   ;;  %s124_s12 = scalar_lea.hbm %s218_s2, 128 }
  0x22   :  { %s36_s9 = sshll.u32 %s152_s8, 4  ;;  %p125_p2 = scmp.ne.s32.totalorder %s218_s2, %s124_s12  ;;  %s37_s9 = int_to_ptr.vmem [resolvable:$true] %s36_s9 }
  0x23   :  { %p128_p3 = scmp.lt.u32.totalorder %s124_s12, %s218_s2 }
  0x25   :  { %p130_p4 = pnand %p128_p3, %p125_p2 }
  0x27   :  { %133 = shalt.err (!%p130_p4)
}
  0x28   :  { %s134_s18 = scalar_lea.vmem %s37_s9, 128  ;;  %p139_p6 = scmp.lt.s32.totalorder %s37_s9, %s37_s9 }
  0x29   :  { %p135_p5 = scmp.ne.s32.totalorder %s37_s9, %s134_s18  ;;  %p140_p7 = scmp.lt.s32.totalorder %s134_s18, %s134_s18 }
  0x2b   :  { %p141_p8 = por %p140_p7, %p139_p6 }
  0x2d   :  { %p142_p9 = pnand %p141_p8, %p135_p5 }
  0x2f   :  { %145 = shalt.err (!%p142_p9)
}
  0x30   :  { %39 = dma.hbm_to_vmem [thread:$0]  %s218_s2, 128, %s37_s9, [#allocation5]  }
  0x31   :  { %146 = dma.done.wait [#allocation3], 256  }
  0x32   :  { %147 = vsyncadd [#allocation3], 4294967040 }
  0x33   :  { %148 = dma.done.wait [#allocation5], 256  }
  0x34   :  { %149 = vsyncadd [#allocation5], 4294967040  ;;  %v153_v0 = vmov 0   ;;  %v51_v1 = vld [vmem:[#allocation4] sm:$0xff]  ;;  %v59_v2 = vld [vmem:[#allocation6] sm:$0xff] }
  0x35   :  { %79 = vset.pattern.permute.xlu0 %v153_v0  ;;  %v49_v4 = vld [vmem:[#allocation2] sm:$0xff]  ;;  %v50_v5 = vld [vmem:[#allocation2 + $0x8] sm:$0xff] }
  0x36   :  { %54 = vperm.xlu0 %79, %v51_v1  }
  0x3a   :  { %62 = vperm.xlu0 %79, %v59_v2  }
  0xb5   :  { %v55_v3 = vpop.permute.xlu0 %54 }
  0xb6   :  { %v57_v6 = vmul.f32 %v55_v3, %v49_v4  ;;  %v58_v7 = vmul.f32 %v55_v3, %v50_v5 }
  0xb9   :  { %v63_v8 = vpop.permute.xlu0 %62 }
  0xba   :  { %v65_v9 = vadd.f32 %v63_v8, %v57_v6  ;;  %v66_v10 = vadd.f32 %v63_v8, %v58_v7 }
  0xbc   :  { %67 = vst [vmem:[%s219_s3] sm:$0xff] %v65_v9  ;;  %68 = vst [vmem:[%s219_s3 + $0x8] sm:$0xff] %v66_v10 }
  0xbd   :  { %73 = vsyncpa [#allocation3], 1 }
  0xbe   :  { %74 = vsyncpa [#allocation5], 1 }

</bundles_post_ra>
